<compile_context>
chip_gen: v5e
topology: v5e:2x2
jax: 0.10.0
libtpu: 0.0.40
codegen_flags: <defaults>
</compile_context>

<pallas_src>
import functools

import jax
import jax.numpy as jnp
from jax.experimental import pallas as pl
from jax.experimental.pallas import tpu as pltpu


def _round_up(x, m):
    return (x + m - 1) // m * m


def _tri_contrastive_kernel(a_ref, p_ref, n_ref, o_ref, *, mode, alpha,
                            n_feat, batch):
    eps_pd = 1e-6  # F.pairwise_distance default eps (added to the difference)
    tb = a_ref.shape[0]

    a = a_ref[...].astype(jnp.float32)
    p = p_ref[...].astype(jnp.float32)
    n = n_ref[...].astype(jnp.float32)

    if mode == "log":
        a = jax.nn.sigmoid(a)
        p = jax.nn.sigmoid(p)
        n = jax.nn.sigmoid(n)

    # pairwise L2 distance along the feature (lane) axis -> (TB, 1)
    dp = a - p + eps_pd
    dn = a - n + eps_pd
    dpos = jnp.sqrt(jnp.sum(dp * dp, axis=1, keepdims=True))
    dneg = jnp.sqrt(jnp.sum(dn * dn, axis=1, keepdims=True))

    if mode == "euclidean":
        per_row = jnp.maximum(alpha + dpos - dneg, 0.0)
    elif mode == "exp":
        ep = jnp.exp(dpos)
        en = jnp.exp(dneg)
        inv = pl.reciprocal(ep + en, approx=True)   # EUP slot, keeps VALU clear
        per_row = ((ep - en) * inv + 1.0) ** 2
    elif mode == "expratio":
        ep = jnp.exp(-dpos)
        en = jnp.exp(-dneg)
        inv = pl.reciprocal(ep + en, approx=True)
        per_row = -jnp.log(ep * inv)
    elif mode == "log":
        beta = float(n_feat)
        eps_l = 1e-9
        dp2 = (dpos * dpos) * (1.0 / beta)
        # NB: reference code sums dist_pos twice (dist_neg term unused) -- kept.
        lp = -jnp.log(-dp2 + 1.0 + eps_l)
        per_row = lp + lp
    else:
        raise ValueError(mode)

    # Zero out rows that only exist because of batch padding.
    row = pl.program_id(0) * tb + jax.lax.broadcasted_iota(jnp.int32, (tb, 1), 0)
    per_row = jnp.where(row < batch, per_row, 0.0)

    # One scalar partial sum per grid step, written as a lane-dense (8, 128)
    # block (one f32 vreg, single unmasked vst); wrapper sums [tile, 0, 0].
    partial = jnp.sum(per_row, axis=0, keepdims=True)          # (1, 1)
    o_ref[...] = jnp.broadcast_to(partial, (8, 128))


def _pick_batch_tile(batch, n_feat):
    """Largest batch tile (multiple of 8, capped at 512 rows) whose
    double-buffered input footprint stays well inside every generation's
    scoped VMEM (v5e 16 MiB default, v7x 64 MiB physical)."""
    n_lane = _round_up(n_feat, 128)           # VMEM pads the lane axis to 128
    budget = 6 * 1024 * 1024                  # budget for the input buffers
    tb = budget // (3 * 2 * n_lane * 4)       # 3 inputs x 2 buffers x 4 B/elem
    tb = max(8, (tb // 8) * 8)
    tb = min(tb, 512)                         # diminishing returns past ~512
    tb = min(tb, _round_up(batch, 8))
    return max(8, tb)


def tri_contrastive(pdist, labels, *, alpha=1.0, size_average=False,
                    mode="euclidean"):
    """pdist: 3-tuple of (B, N) arrays; labels: 3-tuple of (B,) arrays.

    Inputs may be float32 or bfloat16 (math is always done in float32).
    """
    assert mode in ["euclidean", "exp", "log", "expratio"]
    out_anchor, out_pos, out_neg = pdist
    label_anchor, label_pos, label_neg = labels
    B, N = out_anchor.shape
    assert out_anchor.shape[0] == label_anchor.shape[0]
    # Same sanity check as the PyTorch module (on the first element).  Skipped
    # when labels are tracers (e.g. under jax.jit) since it forces a host sync.
    try:
        la0 = int(label_anchor[0])
        lp0 = int(label_pos[0])
        ln0 = int(label_neg[0])
        assert la0 == lp0 and la0 != ln0
    except jax.errors.ConcretizationTypeError:
        pass

    tb = _pick_batch_tile(B, N)
    b_pad = _round_up(B, tb)
    if b_pad != B:
        pad = ((0, b_pad - B), (0, 0))
        out_anchor = jnp.pad(out_anchor, pad)
        out_pos = jnp.pad(out_pos, pad)
        out_neg = jnp.pad(out_neg, pad)
    g = b_pad // tb

    kernel = functools.partial(
        _tri_contrastive_kernel, mode=mode, alpha=float(alpha),
        n_feat=N, batch=B)

    itemsize = jnp.dtype(out_anchor.dtype).itemsize
    flops = 9 * B * N + 16 * B
    if mode == "log":
        transcendentals = 3 * B * N + 4 * B
    elif mode in ("exp", "expratio"):
        transcendentals = 6 * B
    else:
        transcendentals = 2 * B
    cost = pl.CostEstimate(
        flops=int(flops),
        transcendentals=int(transcendentals),
        bytes_accessed=int(3 * b_pad * N * itemsize + g * 8 * 128 * 4))

    partials = pl.pallas_call(
        kernel,
        out_shape=jax.ShapeDtypeStruct((g * 8, 128), jnp.float32),
        grid_spec=pltpu.PrefetchScalarGridSpec(
            num_scalar_prefetch=0,
            grid=(g,),
            in_specs=[
                pl.BlockSpec((tb, N), lambda i: (i, 0)),
                pl.BlockSpec((tb, N), lambda i: (i, 0)),
                pl.BlockSpec((tb, N), lambda i: (i, 0)),
            ],
            out_specs=pl.BlockSpec((8, 128), lambda i: (i, 0)),
        ),
        compiler_params=pltpu.CompilerParams(
            dimension_semantics=("parallel",),
            vmem_limit_bytes=32 * 1024 * 1024),
        cost_estimate=cost,
    )(out_anchor, out_pos, out_neg)

    loss = jnp.sum(partials.reshape(g, 8, 128)[:, 0, 0])
    if size_average:
        loss = loss / B
    return loss


def _reference_loss(a, p, n, mode, alpha=1.0):
    """Pure-JAX reference mirroring the PyTorch module."""
    a = a.astype(jnp.float32)
    p = p.astype(jnp.float32)
    n = n.astype(jnp.float32)
    N = a.shape[1]
    if mode == "log":
        a, p, n = jax.nn.sigmoid(a), jax.nn.sigmoid(p), jax.nn.sigmoid(n)
    dp = jnp.sqrt(jnp.sum((a - p + 1e-6) ** 2, axis=1))
    dn = jnp.sqrt(jnp.sum((a - n + 1e-6) ** 2, axis=1))
    if mode == "euclidean":
        return jnp.sum(jnp.maximum(alpha + dp - dn, 0.0))
    if mode == "exp":
        ep, en = jnp.exp(dp), jnp.exp(dn)
        tot = ep + en
        return jnp.sum((ep / tot - en / tot + 1.0) ** 2)
    if mode == "expratio":
        ep, en = jnp.exp(-dp), jnp.exp(-dn)
        return jnp.sum(-jnp.log(ep / (ep + en)))
    # log mode
    beta = float(N)
    dp2 = dp ** 2 / beta
    lp = -jnp.log(-dp2 + 1.0 + 1e-9)
    return jnp.sum(lp + lp)


if __name__ == "__main__":
    key = jax.random.PRNGKey(0)
    B, N = 8, 32
    k1, k2, k3 = jax.random.split(key, 3)
    anchor = jax.random.normal(k1, (B, N), dtype=jnp.float32)
    pos = jax.random.normal(k2, (B, N), dtype=jnp.float32)
    neg = jax.random.normal(k3, (B, N), dtype=jnp.float32)

    # labels: anchor/pos share a class, neg differs (matches module assertion)
    lab_a = jnp.zeros((B,), dtype=jnp.int32)
    lab_p = jnp.zeros((B,), dtype=jnp.int32)
    lab_n = jnp.ones((B,), dtype=jnp.int32)

    tols = {"euclidean": (1e-5, 1e-5), "exp": (1e-2, 1e-2),
            "expratio": (1e-2, 1e-2), "log": (1e-2, 1e-2)}
    for mode in ["euclidean", "exp", "expratio", "log"]:
        got = tri_contrastive((anchor, pos, neg), (lab_a, lab_p, lab_n),
                              alpha=1.0, size_average=False, mode=mode)
        got = jax.block_until_ready(got)
        want = _reference_loss(anchor, pos, neg, mode, alpha=1.0)
        rtol, atol = tols[mode]
        assert jnp.allclose(got, want, rtol=rtol, atol=atol), (mode, got, want)

    # bf16 ingestion path (halves HBM bytes for this memory-bound op)
    a16 = anchor.astype(jnp.bfloat16)
    p16 = pos.astype(jnp.bfloat16)
    n16 = neg.astype(jnp.bfloat16)
    got16 = tri_contrastive((a16, p16, n16), (lab_a, lab_p, lab_n),
                            alpha=1.0, size_average=False, mode="euclidean")
    got16 = jax.block_until_ready(got16)
    want16 = _reference_loss(a16, p16, n16, "euclidean", alpha=1.0)
    assert jnp.allclose(got16, want16, rtol=1e-4, atol=1e-4), (got16, want16)

    # size_average path
    avg = tri_contrastive((anchor, pos, neg), (lab_a, lab_p, lab_n),
                          alpha=1.0, size_average=True, mode="euclidean")
    avg = jax.block_until_ready(avg)
    want_avg = _reference_loss(anchor, pos, neg, "euclidean", alpha=1.0) / B
    assert jnp.allclose(avg, want_avg, rtol=1e-5, atol=1e-5), (avg, want_avg)

    print("KERNEL_OK")
</pallas_src>

<mosaic_0001>
module attributes {stable_mosaic.version = 11 : i64} {
  func.func @_tri_contrastive_kernel(%arg0: i32, %arg1: memref<8x32xf32, #tpu.memory_space<vmem>>, %arg2: memref<8x32xf32, #tpu.memory_space<vmem>>, %arg3: memref<8x32xf32, #tpu.memory_space<vmem>>, %arg4: memref<8x128xf32, #tpu.memory_space<vmem>>) attributes {dimension_semantics = [#tpu.dimension_semantics<parallel>], iteration_bounds = array<i64: 1>, scalar_prefetch = 0 : i64, scratch_operands = 0 : i64, tpu.core_type = #tpu.core_type<tc>, window_params = [{transform_indices = @transform_0, window_bounds = array<i64: 8, 32>}, {transform_indices = @transform_1, window_bounds = array<i64: 8, 32>}, {transform_indices = @transform_2, window_bounds = array<i64: 8, 32>}, {transform_indices = @transform_3, window_bounds = array<i64: 8, 128>}]} {
    %c0 = arith.constant 0 : index
    %c0_0 = arith.constant 0 : index
    %0 = vector.load %arg1[%c0, %c0_0] : memref<8x32xf32, #tpu.memory_space<vmem>>, vector<8x32xf32>
    %c0_1 = arith.constant 0 : index
    %c0_2 = arith.constant 0 : index
    %1 = vector.load %arg2[%c0_1, %c0_2] : memref<8x32xf32, #tpu.memory_space<vmem>>, vector<8x32xf32>
    %c0_3 = arith.constant 0 : index
    %c0_4 = arith.constant 0 : index
    %2 = vector.load %arg3[%c0_3, %c0_4] : memref<8x32xf32, #tpu.memory_space<vmem>>, vector<8x32xf32>
    %3 = arith.subf %0, %1 : vector<8x32xf32>
    %cst = arith.constant 9.99999997E-7 : f32
    %4 = vector.broadcast %cst : f32 to vector<8x32xf32>
    %5 = arith.addf %3, %4 : vector<8x32xf32>
    %6 = arith.subf %0, %2 : vector<8x32xf32>
    %cst_5 = arith.constant 9.99999997E-7 : f32
    %7 = vector.broadcast %cst_5 : f32 to vector<8x32xf32>
    %8 = arith.addf %6, %7 : vector<8x32xf32>
    %9 = arith.mulf %5, %5 : vector<8x32xf32>
    %cst_6 = arith.constant dense<0.000000e+00> : vector<8xf32>
    %10 = vector.multi_reduction <add>, %9, %cst_6 [1] : vector<8x32xf32> to vector<8xf32>
    %11 = vector.shape_cast %10 : vector<8xf32> to vector<8x1xf32>
    %12 = math.sqrt %11 : vector<8x1xf32>
    %13 = arith.mulf %8, %8 : vector<8x32xf32>
    %cst_7 = arith.constant dense<0.000000e+00> : vector<8xf32>
    %14 = vector.multi_reduction <add>, %13, %cst_7 [1] : vector<8x32xf32> to vector<8xf32>
    %15 = vector.shape_cast %14 : vector<8xf32> to vector<8x1xf32>
    %16 = math.sqrt %15 : vector<8x1xf32>
    %cst_8 = arith.constant 1.000000e+00 : f32
    %17 = vector.broadcast %cst_8 : f32 to vector<8x1xf32>
    %18 = arith.addf %17, %12 : vector<8x1xf32>
    %19 = arith.subf %18, %16 : vector<8x1xf32>
    %cst_9 = arith.constant 0.000000e+00 : f32
    %20 = vector.broadcast %cst_9 : f32 to vector<8x1xf32>
    %21 = arith.maximumf %19, %20 : vector<8x1xf32>
    %c8_i32 = arith.constant 8 : i32
    %22 = arith.muli %arg0, %c8_i32 : i32
    %23 = tpu.iota {dimensions = array<i32: 0>} : vector<8x1xi32>
    %24 = vector.broadcast %22 : i32 to vector<8x1xi32>
    %25 = arith.addi %24, %23 : vector<8x1xi32>
    %c8_i32_10 = arith.constant 8 : i32
    %26 = vector.broadcast %c8_i32_10 : i32 to vector<8x1xi32>
    %27 = arith.cmpi slt, %25, %26 : vector<8x1xi32>
    %cst_11 = arith.constant 0.000000e+00 : f32
    %28 = vector.broadcast %cst_11 : f32 to vector<8x1xf32>
    %29 = arith.select %27, %21, %28 : vector<8x1xi1>, vector<8x1xf32>
    %cst_12 = arith.constant dense<0.000000e+00> : vector<1xf32>
    %30 = vector.multi_reduction <add>, %29, %cst_12 [0] : vector<8x1xf32> to vector<1xf32>
    %31 = vector.shape_cast %30 : vector<1xf32> to vector<1x1xf32>
    %32 = vector.shape_cast %31 : vector<1x1xf32> to vector<1x1xf32>
    %33 = vector.broadcast %32 : vector<1x1xf32> to vector<8x128xf32>
    %c0_13 = arith.constant 0 : index
    %c0_14 = arith.constant 0 : index
    %34 = vector.load %arg4[%c0_13, %c0_14] : memref<8x128xf32, #tpu.memory_space<vmem>>, vector<8x128xf32>
    tpu.vector_store %arg4[%c0_13, %c0_14], %33 {strides = array<i32>} : memref<8x128xf32, #tpu.memory_space<vmem>>, vector<8x128xf32>,
    return
  }
  func.func @transform_0(%arg0: i32) -> (i32, i32) {
    %c0_i32 = arith.constant 0 : i32
    %c0_i32_0 = arith.constant 0 : i32
    return %arg0, %c0_i32 : i32, i32
  }
  func.func @transform_1(%arg0: i32) -> (i32, i32) {
    %c0_i32 = arith.constant 0 : i32
    %c0_i32_0 = arith.constant 0 : i32
    return %arg0, %c0_i32 : i32, i32
  }
  func.func @transform_2(%arg0: i32) -> (i32, i32) {
    %c0_i32 = arith.constant 0 : i32
    %c0_i32_0 = arith.constant 0 : i32
    return %arg0, %c0_i32 : i32, i32
  }
  func.func @transform_3(%arg0: i32) -> (i32, i32) {
    %c0_i32 = arith.constant 0 : i32
    %c0_i32_0 = arith.constant 0 : i32
    return %arg0, %c0_i32 : i32, i32
  }
}

</mosaic_0001>

<bundles_post_ra>
// kernel: tpu_custom_call.1
= control target key start
LH: loop header
LB: loop body
LE: loop exit
PB: predicated region body
PF: predicated region fallthrough
CT: control target
= control target key end

     0   :  { %8 = vsyncpa [#allocation3], 0  ;;  %s277_s0 = inlined_call_operand.hbm [shape: f32[8,32], index: 0, kind: input, shape index: {}]   ;;  %s278_s1 = inlined_call_operand.hbm [shape: f32[8,32], index: 1, kind: input, shape index: {}]   ;;  %s279_s2 = inlined_call_operand.hbm [shape: f32[8,32], index: 2, kind: input, shape index: {}]   ;;  %s280_s3 = inlined_call_operand.hbm [shape: f32[8,128], index: 3, kind: output, shape index: {}]  }
   0x1   :  { %9 = vsyncpa [#allocation6], 0  ;;  %s27_s14 = sshll.u32 %s278_s1, 4  ;;  %s28_s14 = int_to_ptr.hbm [resolvable:$true] %s27_s14 }
   0x2   :  { %10 = vsyncpa [#allocation4], 0  ;;  %s241_s15 = smov [#allocation5]   ;;  %s16_s19 = sshll.u32 %s277_s0, 4  ;;  %s17_s19 = int_to_ptr.hbm [resolvable:$true] %s16_s19 }
   0x3   :  { %s29_s16 = sshll.u32 %s241_s15, 4  ;;  %s242_s20 = smov [#allocation2]   ;;  %s30_s16 = int_to_ptr.vmem [resolvable:$true] %s29_s16 }
   0x4   :  { %32 = dma.hbm_to_vmem [thread:$0]  %s28_s14, 128, %s30_s16, [#allocation6]  }
   0x5   :  { %s18_s21 = sshll.u32 %s242_s20, 4  ;;  %s38_s24 = sshll.u32 %s279_s2, 4  ;;  %s19_s21 = int_to_ptr.vmem [resolvable:$true] %s18_s21  ;;  %s39_s24 = int_to_ptr.hbm [resolvable:$true] %s38_s24 }
   0x6   :  { %21 = dma.hbm_to_vmem [thread:$0]  %s17_s19, 128, %s19_s21, [#allocation3]  }
   0x7   :  { %s243_s1 = smov [#allocation7]  }
   0x8   :  { %s40_s25 = sshll.u32 %s243_s1, 4  ;;  %s41_s25 = int_to_ptr.vmem [resolvable:$true] %s40_s25 }
   0x9   :  { %43 = dma.hbm_to_vmem [thread:$0]  %s39_s24, 128, %s41_s25, [#allocation6]  }
   0xa   :  { %235 = dma.done.wait [#allocation3], 128  }
   0xb   :  { %236 = vsyncadd [#allocation3], 4294967168 }
   0xc   :  { %237 = dma.done.wait [#allocation6], 256  }
   0xd   :  { %238 = vsyncadd [#allocation6], 4294967040  ;;  %v56_v0 = vld [vmem:[#allocation2] sm:$0xff]  ;;  %v57_v1 = vld [vmem:[#allocation5] sm:$0xff]  ;;  %vm64_vm0 = vcmask 261120   ;;  %s244_s0 = smov [#allocation8]  }
   0xe   :  { %v58_v2 = vld [vmem:[#allocation7] sm:$0xff]  ;;  %v59_v3 = vsub.f32 %v56_v0, %v57_v1  ;;  %s118_s2 = sshll.u32 %s244_s0, 4  ;;  %s120_s28 = sshll.u32 %s280_s3, 4  ;;  %s119_s2 = int_to_ptr.vmem [resolvable:$true] %s118_s2  ;;  %s121_s28 = int_to_ptr.hbm [resolvable:$true] %s120_s28 }
   0xf   :  { %v61_v4 = vsub.f32 %v56_v0, %v58_v2 }
  0x10   :  { %v60_v5 = vadd.f32 1e-06, %v59_v3 }
  0x11   :  { %v62_v7 = vadd.f32 1e-06, %v61_v4 }
  0x12   :  { %v63_v6 = vmul.f32 %v60_v5, %v60_v5 }
  0x13   :  { %v80_v9 = vmul.f32 %v62_v7, %v62_v7 }
  0x14   :  { %v65_v8 = vsel %vm64_vm0, %v63_v6, 0.0 }
  0x15   :  { %66 = vadd.xlane.f32.xlu0 %v65_v8  ;;  %v81_v10 = vsel %vm64_vm0, %v80_v9, 0.0 }
  0x1d   :  { %82 = vadd.xlane.f32.xlu0 %v81_v10 }
  0x88   :  { %v67_v11 = vpop.xlane.xlu0 %66 }
  0x89   :  { %135 = vrsqrt.f32 %v67_v11  ;;  %vm75_vm1 = vcmp.eq.f32.partialorder %v67_v11, inf  ;;  %v78_v26 = vand.u32 2147483648, %v67_v11  ;;  %vm77_vm2 = vcmp.eq.f32.partialorder %v67_v11, 0.0 }
  0x8f   :  { %v136_v12 = vpop.eup %135 }
  0x90   :  { %v69_v13 = vmul.f32 %v136_v12, %v67_v11  ;;  %v83_v14 = vpop.xlane.xlu0 %82 }
  0x91   :  { %137 = vrsqrt.f32 %v83_v14  ;;  %vm91_vm3 = vcmp.eq.f32.partialorder %v83_v14, inf  ;;  %v94_v30 = vand.u32 2147483648, %v83_v14  ;;  %vm93_vm4 = vcmp.eq.f32.partialorder %v83_v14, 0.0 }
  0x92   :  { %v70_v15 = vmul.f32 %v136_v12, %v69_v13 }
  0x94   :  { %v71_v16 = vmul.f32 0.5, %v70_v15 }
  0x96   :  { %v72_v17 = vsub.f32 1.5, %v71_v16 }
  0x97   :  { %v138_v18 = vpop.eup %137 }
  0x98   :  { %v73_v19 = vmul.f32 %v136_v12, %v72_v17  ;;  %v85_v20 = vmul.f32 %v138_v18, %v83_v14 }
  0x9a   :  { %v74_v21 = vmul.f32 %v73_v19, %v67_v11  ;;  %v86_v22 = vmul.f32 %v138_v18, %v85_v20 }
  0x9c   :  { %v87_v23 = vmul.f32 0.5, %v86_v22  ;;  %v76_v24 = vsel %vm75_vm1, %v67_v11, %v74_v21 }
  0x9d   :  { %v79_v28 = vsel %vm77_vm2, %v78_v26, %v76_v24 }
  0x9e   :  { %v88_v25 = vsub.f32 1.5, %v87_v23  ;;  %v96_v32 = vadd.f32 1.0, %v79_v28 }
  0xa0   :  { %v89_v27 = vmul.f32 %v138_v18, %v88_v25 }
  0xa2   :  { %v90_v29 = vmul.f32 %v89_v27, %v83_v14 }
  0xa4   :  { %v92_v31 = vsel %vm91_vm3, %v83_v14, %v90_v29 }
  0xa5   :  { %v95_v33 = vsel %vm93_vm4, %v94_v30, %v92_v31 }
  0xa6   :  { %v97_v34 = vsub.f32 %v96_v32, %v95_v33 }
  0xa8   :  { %v98_v35 = vmax.f32 %v97_v34, 0.0 }
  0xaa   :  { %v106_v36 = vrot.slane %v98_v35, 4 }
  0xac   :  { %v107_v37 = vadd.f32 %v106_v36, %v98_v35 }
  0xae   :  { %v108_v38 = vrot.slane %v107_v37, 2 }
  0xb0   :  { %v109_v39 = vadd.f32 %v108_v38, %v107_v37 }
  0xb2   :  { %v110_v40 = vrot.slane %v109_v39, 1 }
  0xb4   :  { %v111_v41 = vadd.f32 %v110_v40, %v109_v39 }
  0xb6   :  { %112 = vst [vmem:[#allocation8] sm:$0xff] %v111_v41 }
  0xb7   :  { %123 = dma.vmem_to_hbm [thread:$0]  %s119_s2, 128, %s121_s28, [#allocation4]  }
  0xb8   :  { %239 = dma.done.wait [#allocation4], 128  }
  0xb9   :  { %240 = vsyncadd [#allocation4], 4294967168 }
  0xba   :  { %128 = vsyncpa [#allocation3], 1 }
  0xbb   :  { %129 = vsyncpa [#allocation6], 1 }
  0xbc   :  { %130 = vsyncpa [#allocation4], 1 }

</bundles_post_ra>
